<compile_context>
chip_gen: v7x
topology: tpu7x:2x2x1
jax: 0.10.0
libtpu: 0.0.40
codegen_flags: <defaults>
</compile_context>

<pallas_src>
import jax
import jax.numpy as jnp
from jax.experimental import pallas as pl
from jax.experimental.pallas import tpu as pltpu

_LANE = 128
_SUBLANE = 8
_NUM_CORE_SPLITS = 2        # leading "parallel" grid axis (v7x: 2 TCs; neutral elsewhere)
_TARGET_TILE_ROWS = 1024    # (1024, 128) f32 block = 512 KiB per input per step


def _round_up(x, m):
    return ((x + m - 1) // m) * m


# ----------------------------------------------------------------------------
# Kernel 1: fused, weighted sum of squared differences (all ladder levels).
#   x, y : (M_pad, 128) slabs (all levels concatenated, zero padded)
#   w    : (M_pad, 1)   per-row weight = lambda_i / n_i (0 on padding rows)
#   out  : (2*8, 128)   per-core partials (only element [8*c, 0] is non-zero)
# ----------------------------------------------------------------------------
def _weighted_sse_kernel(x_ref, y_ref, w_ref, o_ref, acc_ref):
    j = pl.program_id(1)

    @pl.when(j == 0)
    def _init():
        acc_ref[...] = jnp.zeros_like(acc_ref)

    d = x_ref[...].astype(jnp.float32) - y_ref[...].astype(jnp.float32)
    acc_ref[...] += w_ref[...] * d * d          # VALU only; kernel is DMA-bound

    @pl.when(j == pl.num_programs(1) - 1)
    def _finalize():
        s = jnp.sum(acc_ref[...])               # single cross-lane reduce per core
        rows = jax.lax.broadcasted_iota(jnp.int32, o_ref.shape, 0)
        cols = jax.lax.broadcasted_iota(jnp.int32, o_ref.shape, 1)
        o_ref[...] = jnp.where((rows == 0) & (cols == 0), s, 0.0)


def fused_weighted_mse(lambdas, recon, clean):
    """sum_i lambdas[i] * mean((recon[i] - clean[i])**2) in one pallas_call."""
    assert len(recon) == len(clean) == len(lambdas)
    common = jnp.result_type(*(a.dtype for a in tuple(recon) + tuple(clean)))

    x_rows, y_rows, w_rows = [], [], []
    for lam, r, c in zip(lambdas, recon, clean):
        assert r.shape == c.shape
        n = r.size
        n_pad = _round_up(n, _LANE)
        xr = r.reshape(-1).astype(common)
        yr = c.reshape(-1).astype(common)
        if n_pad != n:                      # zero pad: diff == 0 -> no contribution
            xr = jnp.pad(xr, (0, n_pad - n))
            yr = jnp.pad(yr, (0, n_pad - n))
        rows = n_pad // _LANE
        x_rows.append(xr.reshape(rows, _LANE))
        y_rows.append(yr.reshape(rows, _LANE))
        w_rows.append(jnp.full((rows, 1), float(lam) / n, dtype=jnp.float32))

    # TODO(synk): for very large levels the concat copy adds HBM traffic; a
    # scalar-prefetch block->level table over the original arrays would avoid it.
    x2 = jnp.concatenate(x_rows, axis=0)
    y2 = jnp.concatenate(y_rows, axis=0)
    w2 = jnp.concatenate(w_rows, axis=0)
    m = x2.shape[0]

    # Tile selection: ~512 KiB per f32 input block; 2 inputs double-buffered is
    # ~2 MiB, comfortably inside v7x's 32 MiB scoped / 64 MiB physical VMEM.
    if m >= _NUM_CORE_SPLITS * _TARGET_TILE_ROWS:
        tile = _TARGET_TILE_ROWS
    else:
        tile = _round_up(pl.cdiv(m, _NUM_CORE_SPLITS), _SUBLANE)
    blocks_per_core = pl.cdiv(m, _NUM_CORE_SPLITS * tile)
    m_pad = _NUM_CORE_SPLITS * blocks_per_core * tile
    if m_pad != m:                          # padded rows carry weight 0
        x2 = jnp.pad(x2, ((0, m_pad - m), (0, 0)))
        y2 = jnp.pad(y2, ((0, m_pad - m), (0, 0)))
        w2 = jnp.pad(w2, ((0, m_pad - m), (0, 0)))

    def data_idx(c, j):
        return (c * blocks_per_core + j, 0)

    partials = pl.pallas_call(
        _weighted_sse_kernel,
        out_shape=jax.ShapeDtypeStruct(
            (_NUM_CORE_SPLITS * _SUBLANE, _LANE), jnp.float32),
        grid=(_NUM_CORE_SPLITS, blocks_per_core),
        in_specs=[
            pl.BlockSpec((tile, _LANE), data_idx),
            pl.BlockSpec((tile, _LANE), data_idx),
            pl.BlockSpec((tile, 1), data_idx),
        ],
        out_specs=pl.BlockSpec((_SUBLANE, _LANE), lambda c, j: (c, 0)),
        scratch_shapes=[pltpu.VMEM((tile, _LANE), jnp.float32)],
        compiler_params=pltpu.CompilerParams(
            dimension_semantics=("parallel", "arbitrary")),
    )(x2, y2, w2)
    return jnp.sum(partials)                # only 2 non-zero entries (1 per core)


# ----------------------------------------------------------------------------
# Kernel 2: softmax cross-entropy with integer labels, mean over batch.
# ----------------------------------------------------------------------------
def _ce_kernel(logits_ref, labels_ref, o_ref):
    logits = logits_ref[...].astype(jnp.float32)          # (B, Cpad), lane-dense
    b, c = logits.shape
    m = jnp.max(logits, axis=-1, keepdims=True)
    z = logits - m
    lse = jnp.log(jnp.sum(jnp.exp(z), axis=-1, keepdims=True))
    cols = jax.lax.broadcasted_iota(jnp.int32, (b, c), 1)
    onehot = cols == labels_ref[...]                      # (B,1) broadcast
    true_z = jnp.sum(jnp.where(onehot, z, 0.0), axis=-1, keepdims=True)
    o_ref[0, 0] = jnp.sum(lse - true_z) / jnp.float32(b)


def cross_entropy_pallas(logits, labels):
    """nn.CrossEntropyLoss() (mean reduction) for 2D logits, 1D int labels."""
    b, c = logits.shape
    c_pad = _round_up(c, _LANE)
    if c_pad != c:
        # Pad classes with a very negative logit: exp underflows to 0 and labels
        # never index the padding, so the result is exact and lane-dense.
        logits = jnp.pad(logits, ((0, 0), (0, c_pad - c)), constant_values=-1e30)
    labels2 = labels.astype(jnp.int32).reshape(b, 1)
    # TODO(synk): for very large B this single whole-array block should be tiled
    # over the batch with an accumulator; fine for classification-sized batches.
    out = pl.pallas_call(
        _ce_kernel,
        out_shape=jax.ShapeDtypeStruct((1, 1), jnp.float32),
        in_specs=[
            pl.BlockSpec(memory_space=pltpu.MemorySpace.VMEM),
            pl.BlockSpec(memory_space=pltpu.MemorySpace.VMEM),
        ],
        out_specs=pl.BlockSpec(memory_space=pltpu.MemorySpace.SMEM),
    )(logits, labels2)
    return out[0, 0]


# ----------------------------------------------------------------------------
# Module-equivalent wrappers (glue stays in plain JAX, fully jit-able).
# ----------------------------------------------------------------------------
def ladder_net_loss(lambdas, *, clean, recon, code, **_):
    # `code` (and the PyTorch module's unused nn.L1Loss) do not affect the loss.
    return {"loss": fused_weighted_mse(lambdas, recon, clean)}


def owl_net_loss(lambdas, **kwargs):
    c = kwargs["c"]
    _c_ = kwargs["_c_"]
    recon_loss = ladder_net_loss(lambdas, **kwargs)       # {'loss': scalar}
    class_loss = cross_entropy_pallas(_c_, c)
    loss = recon_loss
    # TODO(synk): the PyTorch reference calls recon_loss.detach().item() on a
    # dict (which would raise) and .item() forces a host sync; we return
    # jit-able device scalars and leave float() conversion to logging code.
    return {"loss": loss, "class": class_loss, "recon": recon_loss["loss"]}


def make_owl_net_loss(lambdas):
    """Returns a jitted loss(clean, recon, code, c, _c_) -> pytree of device scalars."""
    lambdas = tuple(float(l) for l in lambdas)

    @jax.jit
    def loss_fn(clean, recon, code, c, _c_):
        return owl_net_loss(lambdas, clean=clean, recon=recon, code=code,
                            c=c, _c_=_c_)

    return loss_fn


# ----------------------------------------------------------------------------
# Demo / smoke test.
# ----------------------------------------------------------------------------
if __name__ == "__main__":
    key = jax.random.PRNGKey(0)
    keys = jax.random.split(key, 16)

    # Ladder levels (NCHW). The last level's size (210) is deliberately not a
    # multiple of 128 to exercise the zero-padding path.
    level_shapes = [(2, 4, 16, 16), (2, 8, 8, 8), (2, 16, 8, 8), (2, 3, 5, 7)]
    lambdas = [1.0, 0.5, 0.25, 0.1]

    clean = [jax.random.normal(keys[i], s, dtype=jnp.float32)
             for i, s in enumerate(level_shapes)]
    recon = [jax.random.normal(keys[4 + i], s, dtype=jnp.float32)
             for i, s in enumerate(level_shapes)]
    code = [jax.random.normal(keys[8 + i], s, dtype=jnp.float32)
            for i, s in enumerate(level_shapes)]          # unused by the loss

    batch, num_classes = 2, 10
    logits = jax.random.normal(keys[12], (batch, num_classes), dtype=jnp.float32)
    labels = jnp.array([3, 7], dtype=jnp.int32)

    loss_fn = make_owl_net_loss(lambdas)
    out = loss_fn(clean, recon, code, labels, logits)
    out = jax.block_until_ready(out)

    # Silent correctness check against a pure-JAX reference.
    ref_recon = sum(jnp.float32(l) * jnp.mean((r - c_) ** 2)
                    for l, r, c_ in zip(lambdas, recon, clean))
    logz = jax.nn.logsumexp(logits, axis=-1)
    ref_ce = jnp.mean(logz - logits[jnp.arange(batch), labels])
    assert abs(float(out["recon"]) - float(ref_recon)) < 5e-4
    assert abs(float(out["loss"]["loss"]) - float(ref_recon)) < 5e-4
    assert abs(float(out["class"]) - float(ref_ce)) < 5e-4

    print("KERNEL_OK")
</pallas_src>

<mosaic_0001>
module attributes {stable_mosaic.version = 11 : i64} {
  func.func @_weighted_sse_kernel(%arg0: i32, %arg1: i32, %arg2: memref<24x128xf32, #tpu.memory_space<vmem>>, %arg3: memref<24x128xf32, #tpu.memory_space<vmem>>, %arg4: memref<24x1xf32, #tpu.memory_space<vmem>>, %arg5: memref<8x128xf32, #tpu.memory_space<vmem>>, %arg6: memref<24x128xf32, #tpu.memory_space<vmem>>) attributes {dimension_semantics = [#tpu.dimension_semantics<parallel>, #tpu.dimension_semantics<arbitrary>], iteration_bounds = array<i64: 2, 1>, scalar_prefetch = 0 : i64, scratch_operands = 1 : i64, tpu.core_type = #tpu.core_type<tc>, window_params = [{transform_indices = @transform_0, window_bounds = array<i64: 24, 128>}, {transform_indices = @transform_1, window_bounds = array<i64: 24, 128>}, {transform_indices = @transform_2, window_bounds = array<i64: 24, 1>}, {transform_indices = @transform_3, window_bounds = array<i64: 8, 128>}]} {
    %c0_i32 = arith.constant 0 : i32
    %0 = arith.cmpi eq, %arg1, %c0_i32 : i32
    %1 = arith.extui %0 : i1 to i32
    %c0_i32_0 = arith.constant 0 : i32
    %2 = arith.cmpi ne, %1, %c0_i32_0 : i32
    scf.if %2 {
      %cst = arith.constant 0.000000e+00 : f32
      %16 = vector.broadcast %cst : f32 to vector<24x128xf32>
      %c0_12 = arith.constant 0 : index
      %c0_13 = arith.constant 0 : index
      %17 = vector.load %arg6[%c0_12, %c0_13] : memref<24x128xf32, #tpu.memory_space<vmem>>, vector<24x128xf32>
      tpu.vector_store %arg6[%c0_12, %c0_13], %16 {strides = array<i32>} : memref<24x128xf32, #tpu.memory_space<vmem>>, vector<24x128xf32>,
    } else {
    }
    %c0 = arith.constant 0 : index
    %c0_1 = arith.constant 0 : index
    %3 = vector.load %arg2[%c0, %c0_1] : memref<24x128xf32, #tpu.memory_space<vmem>>, vector<24x128xf32>
    %c0_2 = arith.constant 0 : index
    %c0_3 = arith.constant 0 : index
    %4 = vector.load %arg3[%c0_2, %c0_3] : memref<24x128xf32, #tpu.memory_space<vmem>>, vector<24x128xf32>
    %5 = arith.subf %3, %4 : vector<24x128xf32>
    %c0_4 = arith.constant 0 : index
    %c0_5 = arith.constant 0 : index
    %6 = vector.load %arg6[%c0_4, %c0_5] : memref<24x128xf32, #tpu.memory_space<vmem>>, vector<24x128xf32>
    %c0_6 = arith.constant 0 : index
    %c0_7 = arith.constant 0 : index
    %7 = vector.load %arg4[%c0_6, %c0_7] : memref<24x1xf32, #tpu.memory_space<vmem>>, vector<24x1xf32>
    %8 = vector.broadcast %7 : vector<24x1xf32> to vector<24x128xf32>
    %9 = arith.mulf %8, %5 : vector<24x128xf32>
    %10 = arith.mulf %9, %5 : vector<24x128xf32>
    %11 = arith.addf %6, %10 : vector<24x128xf32>
    %c0_8 = arith.constant 0 : index
    %c0_9 = arith.constant 0 : index
    %12 = vector.load %arg6[%c0_8, %c0_9] : memref<24x128xf32, #tpu.memory_space<vmem>>, vector<24x128xf32>
    tpu.vector_store %arg6[%c0_8, %c0_9], %11 {strides = array<i32>} : memref<24x128xf32, #tpu.memory_space<vmem>>, vector<24x128xf32>,
    %c0_i32_10 = arith.constant 0 : i32
    %13 = arith.cmpi eq, %arg1, %c0_i32_10 : i32
    %14 = arith.extui %13 : i1 to i32
    %c0_i32_11 = arith.constant 0 : i32
    %15 = arith.cmpi ne, %14, %c0_i32_11 : i32
    scf.if %15 {
      %c0_12 = arith.constant 0 : index
      %c0_13 = arith.constant 0 : index
      %16 = vector.load %arg6[%c0_12, %c0_13] : memref<24x128xf32, #tpu.memory_space<vmem>>, vector<24x128xf32>
      %17 = vector.shape_cast %16 : vector<24x128xf32> to vector<1x24x128xf32>
      %cst = arith.constant dense<0.000000e+00> : vector<1xf32>
      %18 = vector.multi_reduction <add>, %17, %cst [1, 2] : vector<1x24x128xf32> to vector<1xf32>
      %19 = vector.shape_cast %18 : vector<1xf32> to vector<1x1x1xf32>
      %20 = vector.extract %19[0, 0, 0] : f32 from vector<1x1x1xf32>
      %21 = tpu.iota {dimensions = array<i32: 0>} : vector<8x128xi32>
      %22 = tpu.iota {dimensions = array<i32: 1>} : vector<8x128xi32>
      %c0_i32_14 = arith.constant 0 : i32
      %23 = vector.broadcast %c0_i32_14 : i32 to vector<8x128xi32>
      %24 = arith.cmpi eq, %21, %23 : vector<8x128xi32>
      %c0_i32_15 = arith.constant 0 : i32
      %25 = vector.broadcast %c0_i32_15 : i32 to vector<8x128xi32>
      %26 = arith.cmpi eq, %22, %25 : vector<8x128xi32>
      %27 = arith.andi %24, %26 : vector<8x128xi1>
      %cst_16 = arith.constant 0.000000e+00 : f32
      %28 = vector.broadcast %20 : f32 to vector<8x128xf32>
      %29 = vector.broadcast %cst_16 : f32 to vector<8x128xf32>
      %30 = arith.select %27, %28, %29 : vector<8x128xi1>, vector<8x128xf32>
      %c0_17 = arith.constant 0 : index
      %c0_18 = arith.constant 0 : index
      %31 = vector.load %arg5[%c0_17, %c0_18] : memref<8x128xf32, #tpu.memory_space<vmem>>, vector<8x128xf32>
      tpu.vector_store %arg5[%c0_17, %c0_18], %30 {strides = array<i32>} : memref<8x128xf32, #tpu.memory_space<vmem>>, vector<8x128xf32>,
    } else {
    }
    return
  }
  func.func @transform_0(%arg0: i32, %arg1: i32) -> (i32, i32) {
    %c1_i32 = arith.constant 1 : i32
    %0 = arith.muli %arg0, %c1_i32 : i32
    %1 = arith.addi %0, %arg1 : i32
    %c0_i32 = arith.constant 0 : i32
    %c0_i32_0 = arith.constant 0 : i32
    return %1, %c0_i32 : i32, i32
  }
  func.func @transform_1(%arg0: i32, %arg1: i32) -> (i32, i32) {
    %c1_i32 = arith.constant 1 : i32
    %0 = arith.muli %arg0, %c1_i32 : i32
    %1 = arith.addi %0, %arg1 : i32
    %c0_i32 = arith.constant 0 : i32
    %c0_i32_0 = arith.constant 0 : i32
    return %1, %c0_i32 : i32, i32
  }
  func.func @transform_2(%arg0: i32, %arg1: i32) -> (i32, i32) {
    %c1_i32 = arith.constant 1 : i32
    %0 = arith.muli %arg0, %c1_i32 : i32
    %1 = arith.addi %0, %arg1 : i32
    %c0_i32 = arith.constant 0 : i32
    %c0_i32_0 = arith.constant 0 : i32
    return %1, %c0_i32 : i32, i32
  }
  func.func @transform_3(%arg0: i32, %arg1: i32) -> (i32, i32) {
    %c0_i32 = arith.constant 0 : i32
    %c0_i32_0 = arith.constant 0 : i32
    return %arg0, %c0_i32 : i32, i32
  }
}

module attributes {stable_mosaic.version = 11 : i64} {
  func.func @_ce_kernel(%arg0: memref<2x128xf32, #tpu.memory_space<vmem>>, %arg1: memref<2x1xi32, #tpu.memory_space<vmem>>, %arg2: memref<1x1xf32, #tpu.memory_space<smem>>) attributes {dimension_semantics = [], scalar_prefetch = 0 : i64, scratch_operands = 0 : i64, tpu.core_type = #tpu.core_type<tc>} {
    %c0 = arith.constant 0 : index
    %c0_0 = arith.constant 0 : index
    %0 = vector.load %arg0[%c0, %c0_0] : memref<2x128xf32, #tpu.memory_space<vmem>>, vector<2x128xf32>
    %cst = arith.constant dense<0xFF800000> : vector<2xf32>
    %1 = vector.multi_reduction <maximumf>, %0, %cst [1] : vector<2x128xf32> to vector<2xf32>
    %2 = vector.shape_cast %1 : vector<2xf32> to vector<2x1xf32>
    %3 = vector.broadcast %2 : vector<2x1xf32> to vector<2x128xf32>
    %4 = arith.subf %0, %3 : vector<2x128xf32>
    %5 = math.exp %4 : vector<2x128xf32>
    %cst_1 = arith.constant dense<0.000000e+00> : vector<2xf32>
    %6 = vector.multi_reduction <add>, %5, %cst_1 [1] : vector<2x128xf32> to vector<2xf32>
    %7 = vector.shape_cast %6 : vector<2xf32> to vector<2x1xf32>
    %8 = math.log %7 : vector<2x1xf32>
    %9 = tpu.iota {dimensions = array<i32: 1>} : vector<2x128xi32>
    %c0_2 = arith.constant 0 : index
    %c0_3 = arith.constant 0 : index
    %10 = vector.load %arg1[%c0_2, %c0_3] : memref<2x1xi32, #tpu.memory_space<vmem>>, vector<2x1xi32>
    %11 = vector.broadcast %10 : vector<2x1xi32> to vector<2x128xi32>
    %12 = arith.cmpi eq, %9, %11 : vector<2x128xi32>
    %cst_4 = arith.constant 0.000000e+00 : f32
    %13 = vector.broadcast %cst_4 : f32 to vector<2x128xf32>
    %14 = arith.select %12, %4, %13 : vector<2x128xi1>, vector<2x128xf32>
    %cst_5 = arith.constant dense<0.000000e+00> : vector<2xf32>
    %15 = vector.multi_reduction <add>, %14, %cst_5 [1] : vector<2x128xf32> to vector<2xf32>
    %16 = vector.shape_cast %15 : vector<2xf32> to vector<2x1xf32>
    %17 = arith.subf %8, %16 : vector<2x1xf32>
    %18 = vector.shape_cast %17 : vector<2x1xf32> to vector<1x2x1xf32>
    %cst_6 = arith.constant dense<0.000000e+00> : vector<1xf32>
    %19 = vector.multi_reduction <add>, %18, %cst_6 [1, 2] : vector<1x2x1xf32> to vector<1xf32>
    %20 = vector.shape_cast %19 : vector<1xf32> to vector<1x1x1xf32>
    %21 = vector.extract %20[0, 0, 0] : f32 from vector<1x1x1xf32>
    %cst_7 = arith.constant 2.000000e+00 : f32
    %22 = arith.divf %21, %cst_7 : f32
    %c0_8 = arith.constant 0 : index
    %c0_9 = arith.constant 0 : index
    %23 = memref.load %arg2[%c0_8, %c0_9] : memref<1x1xf32, #tpu.memory_space<smem>>
    memref.store %22, %arg2[%c0_8, %c0_9] : memref<1x1xf32, #tpu.memory_space<smem>>
    return
  }
}

</mosaic_0001>

<bundles_post_ra>
// kernel: loss_fn.2
= control target key start
LH: loop header
LB: loop body
LE: loop exit
PB: predicated region body
PF: predicated region fallthrough
CT: control target
= control target key end

     0   :  { %s494_s12 = smov 0   ;;  %s496_s13 = smov 0   ;;  %s538_s0 = inlined_call_operand.vmem [shape: f32[48,128], index: 0, kind: input, shape index: {}]   ;;  %s539_s1 = inlined_call_operand.vmem [shape: f32[48,128], index: 1, kind: input, shape index: {}]   ;;  %s540_s2 = inlined_call_operand.vmem [shape: f32[48,1], index: 2, kind: input, shape index: {}]   ;;  %s541_s3 = inlined_call_operand.vmem [shape: f32[16,128], index: 3, kind: output, shape index: {}]  }
   0x1   :  { %s498_s14 = smov 0  }
   0x2 LB: > { %s25_s15 = sadd.s32 1, %s467_s13  ;;  %p413_p0 = scmp.ge.s32.totalorder %s471_s14, 1  ;;  %s471_s14 = sphi %s498_s14, %s13_s14   ;;  %s467_s13 = sphi %s496_s13, %s543_s13   ;;  %s463_s12 = sphi %s494_s12, %s542_s12  }
   0x3   : > { %p27_p1 = scmp.ge.s32.totalorder %s25_s15, 2  ;;  %p184_p2 = scmp.lt.s32.totalorder %s471_s14, 3 }
   0x5   : > { %s545_s15 = smov (%p27_p1, %s25_s15), 0  ;;  %p185_p3 = pnand %p413_p0, %p184_p2 }
   0x6   : > { %s221_s16 = smul.u32 (!%p185_p3), 3, %s463_s12  ;;  %v473_v0 = vmov (!%p185_p3), 0   ;;  %v314_v31 = vlaneseq (!%p185_p3)  ;;  %p244_p5 = scmp.lt.s32.totalorder (!%p185_p3), %s463_s12, 1 }
   0x7   : > { %188 = sbr.rel (%p185_p3) target bundleno = 365 (0x16d), region = 32  ;;  %447 = vset.pattern.permute.xlu0 (!%p185_p3), %v473_v0  ;;  %448 = vset.pattern.permute.xlu1 (!%p185_p3), %v473_v0 }
   0x8   : > { %p222_p4 = scmp.lt.s32.totalorder (!%p185_p3), %s221_s16, 5  ;;  %v315_v32 = vshrl.u32 (!%p185_p3), %v314_v31, 7  ;;  %v317_v33 = vand.u32 (!%p185_p3), 127, %v314_v31 }
   0xa   : > { %vm318_vm0 = vcmp.eq.s32.totalorder (!%p185_p3), %v315_v32, 0  ;;  %vm319_vm1 = vcmp.eq.s32.totalorder (!%p185_p3), %v317_v33, 0 }
   0xb   : > { %vm320_vm2 = vmand (!%p185_p3), %vm318_vm0, %vm319_vm1 }
   0xe   : > { %s547_s16 = smov (!%p222_p4, %s221_s16), 5  ;;  %s549_s12 = smov (!%p244_p5, %s463_s12), 1 }
   0xf   : > { %s414_s17 = sshll.u32 %s547_s16, 3  ;;  %s417_s27 = sshll.u32 %s549_s12, 3 }
  0x10   : > { %s241_s20 = scalar_lea.vmem %s540_s2, %s414_s17  ;;  %s225_s23 = scalar_lea.vmem %s538_s0, %s414_s17 }
  0x11   : > { %v267_v1 = vld [vmem:[%s241_s20] sm:$0xff]  ;;  %v269_v2 = vld [vmem:[%s241_s20 + $0x10] sm:$0xff]  ;;  %v268_v3 = vld [vmem:[%s241_s20 + $0x8] sm:$0xff]  ;;  %s233_s26 = scalar_lea.vmem %s539_s1, %s414_s17  ;;  %s247_s30 = scalar_lea.vmem %s541_s3, %s417_s27 }
  0x12   : > { %272 = vperm.xlu0 %447, %v267_v1   ;;  %282 = vperm.xlu1 %448, %v269_v2   ;;  %v255_v4 = vld [vmem:[%s225_s23] sm:$0xff]  ;;  %v257_v6 = vld [vmem:[%s225_s23 + $0x10] sm:$0xff]  ;;  %v256_v8 = vld [vmem:[%s225_s23 + $0x8] sm:$0xff] }
  0x13   : > { %v258_v5 = vld [vmem:[%s233_s26] sm:$0xff]  ;;  %v260_v7 = vld [vmem:[%s233_s26 + $0x10] sm:$0xff]  ;;  %v259_v9 = vld [vmem:[%s233_s26 + $0x8] sm:$0xff] }
  0x14   : > { %v261_v10 = vsub.f32 %v255_v4, %v258_v5  ;;  %v263_v11 = vsub.f32 %v257_v6, %v260_v7  ;;  %v262_v14 = vsub.f32 %v256_v8, %v259_v9 }
  0x16   : > { %277 = vperm.xlu0 %447, %v268_v3  }
  0x91   : > { %v273_v12 = vpop.permute.xlu0 %272  ;;  %v283_v13 = vpop.permute.xlu1 %282 }
  0x92   : > { %v285_v15 = vmul.f32 %v273_v12, %v261_v10  ;;  %v287_v16 = vmul.f32 %v283_v13, %v263_v11 }
  0x94   : > { %v288_v19 = vmul.f32 %v285_v15, %v261_v10  ;;  %v290_v21 = vmul.f32 %v287_v16, %v263_v11 }
  0x95   : > { %v278_v17 = vpop.permute.xlu0 %277 }
  0x96   : > { %v286_v18 = vmul.f32 %v278_v17, %v262_v14 }
  0x98   : > { %v289_v20 = vmul.f32 %v286_v18, %v262_v14 }
  0x9a   : > { %v303_v22 = vadd.f32 %v289_v20, %v288_v19 }
  0x9c   : > { %v304_v23 = vadd.f32 %v303_v22, %v290_v21 }
  0x9e   : > { %305 = vadd.xlane.f32.xlu1 %v304_v23 }
 0x12b   : > { %v306_v24 = vpop.xlane.xlu1 %305 }
 0x12c   : > { %v307_v25 = vrot.slane %v306_v24, 4 }
 0x12e   : > { %v308_v26 = vadd.f32 %v307_v25, %v306_v24 }
 0x130   : > { %v309_v27 = vrot.slane %v308_v26, 2 }
 0x132   : > { %v310_v28 = vadd.f32 %v309_v27, %v308_v26 }
 0x134   : > { %v311_v29 = vrot.slane %v310_v28, 1 }
 0x136   : > { %v312_v30 = vadd.f32 %v311_v29, %v310_v28 }
 0x138   : > { %420 = vpush %v312_v30 }
 0x169   : > { %s421_s4 = spop %420 }
 0x16a   : > { %v321_v34 = vstv %s421_s4 }
 0x16b   : > { %v322_v35 = vsel %vm320_vm2, %v321_v34, 0.0 }
 0x16c   : > { %323 = vst [vmem:[%s247_s30] sm:$0xff] %v322_v35 }
 0x16d PF: > { %s13_s14 = sadd.s32 1, %s471_s14   ;;  %s542_s12 = smov %s467_s13 }
 0x16e   : > { %p10_p6 = scmp.ge.s32.totalorder %s13_s14, 4   ;;  %s543_s13 = smov %s545_s15 }
 0x170   :  { %12 = sbr.rel (!%p10_p6) target bundleno = 2 (0x2), region = 76 }

// kernel: loss_fn.3
= control target key start
LH: loop header
LB: loop body
LE: loop exit
PB: predicated region body
PF: predicated region fallthrough
CT: control target
= control target key end

     0   :  { %vm13_vm0 = vcmask 1041408   ;;  %v87_v2 = vmov 0   ;;  %s125_s0 = inlined_call_operand.vmem [shape: f32[2,128], index: 0, kind: input, shape index: {}]   ;;  %s126_s1 = inlined_call_operand.vmem [shape: s32[2,1], index: 1, kind: input, shape index: {}]   ;;  %s127_s2 = inlined_call_operand.hbm [shape: f32[1,1], index: 2, kind: output, shape index: {}]  }
   0x1   :  { %v12_v0 = vld [vmem:[%s125_s0] sm:$0x3]  ;;  %70 = vset.pattern.permute.xlu0 %v87_v2 }
   0x2   :  { %v14_v1 = vsel %vm13_vm0, %v12_v0, -inf }
   0x3   :  { %7 = vsyncpa [#allocation3], 0  ;;  %15 = vmax.xlane.f32.xlu0 %v14_v1  ;;  %v27_v3 = vld [vmem:[%s126_s1] sm:$0x3]  ;;  %v25_v7 = vlaneseq  ;;  %vm37_vm2 = vcmask 1024   ;;  %s75_s15 = scalar_lea.hbm %s127_s2, 16 }
   0x4   :  { %p76_p0 = scmp.ne.s32.totalorder %s127_s2, %s75_s15  ;;  %p79_p1 = scmp.lt.u32.totalorder %s75_s15, %s127_s2 }
   0x5   :  { %v26_v8 = vand.u32 127, %v25_v7 }
   0x6   :  { %p81_p2 = pnand %p79_p1, %p76_p0 }
  0x19   :  { %29 = vperm.xlu0 %70, %v27_v3  }
  0x90   :  { %v16_v4 = vpop.xlane.xlu0 %15 }
  0x91   :  { %v17_v5 = vsub.f32 %v12_v0, %v16_v4 }
  0x93   :  { %v18_v6 = vmul.f32 1.442695, %v17_v5 }
  0x95   :  { %71 = vpow2.f32 %v18_v6 }
  0x98   :  { %v30_v9 = vpop.permute.xlu0 %29 }
  0x99   :  { %vm31_vm1 = vcmp.eq.s32.totalorder %v26_v8, %v30_v9 }
  0x9a   :  { %v32_v12 = vsel %vm31_vm1, %v17_v5, 0.0 }
  0x9b   :  { %v33_v13 = vsel %vm13_vm0, %v32_v12, 0.0 }
  0x9f   :  { %v72_v10 = vpop.eup %71 }
  0xa0   :  { %v20_v11 = vsel %vm13_vm0, %v72_v10, 0.0 }
  0xa1   :  { %21 = vadd.xlane.f32.xlu1 %v20_v11 }
  0xa5   :  { %34 = vadd.xlane.f32.xlu1 %v33_v13 }
 0x12e   :  { %v22_v14 = vpop.xlane.xlu1 %21 }
 0x12f   :  { %73 = vlog2.f32 %v22_v14 }
 0x132   :  { %v35_v17 = vpop.xlane.xlu1 %34 }
 0x139   :  { %v74_v15 = vpop.eup %73 }
 0x13a   :  { %v24_v16 = vmul.f32 0.6931472, %v74_v15 }
 0x13c   :  { %v36_v18 = vsub.f32 %v24_v16, %v35_v17 }
 0x13e   :  { %v38_v19 = vsel %vm37_vm2, %v36_v18, 0.0 }
 0x13f   :  { %39 = vadd.xlane.f32.xlu1 %v38_v19 }
 0x1cc   :  { %v40_v20 = vpop.xlane.xlu1 %39 }
 0x1cd   :  { %v41_v21 = vrot.slane %v40_v20, 4 }
 0x1cf   :  { %v42_v22 = vadd.f32 %v41_v21, %v40_v20 }
 0x1d1   :  { %v43_v23 = vrot.slane %v42_v22, 2 }
 0x1d3   :  { %v44_v24 = vadd.f32 %v43_v23, %v42_v22 }
 0x1d5   :  { %v45_v25 = vrot.slane %v44_v24, 1 }
 0x1d7   :  { %v46_v26 = vadd.f32 %v45_v25, %v44_v24 }
 0x1d9   :  { %66 = vpush %v46_v26 }
 0x20a   :  { %s67_s0 = spop %66 }
 0x20b   :  { %s50_s1 = smul.f32 0.5, %s67_s0 }
 0x20d   :  { %52 = sst [smem:[#allocation2]] %s50_s1 }
 0x20e   :  { %84 = shalt.err (!%p81_p2)
}
 0x20f   :  { %s88_s20 = smov [#allocation2]  }
 0x210   :  { %60 = dma.smem_to_hbm %s88_s20, 16, %s127_s2, [#allocation3]  }
 0x211   :  { %85 = dma.done.wait [#allocation3], 16  }
 0x212   :  { %86 = vsyncadd [#allocation3], 4294967280 }
 0x213   :  { %64 = sfence }
 0x214   :  { %65 = vsyncpa [#allocation3], 1 }

</bundles_post_ra>
